<compile_context>
chip_gen: v6e
topology: v6e:2x2x1
jax: 0.10.0
libtpu: 0.0.40
codegen_flags: <defaults>
</compile_context>

<pallas_src>
import functools

import jax
import jax.numpy as jnp
from jax import lax
from jax.experimental import pallas as pl
from jax.experimental.pallas import tpu as pltpu


def _layernorm3d_kernel(x_ref, w_ref, b_ref, o_ref, *, eps: float):
    # x_ref: (1, C, TS)   w_ref, b_ref: (C, 1)   o_ref: (1, C, TS)
    x = x_ref[...].astype(jnp.float32)
    u = jnp.mean(x, axis=1, keepdims=True)                 # (1, 1, TS)
    d = x - u
    s = jnp.mean(d * d, axis=1, keepdims=True)             # (1, 1, TS)  (biased var)
    y = d * lax.rsqrt(s + eps)                             # (1, C, TS)
    w = w_ref[...].astype(jnp.float32)                     # (C, 1) -> bcast over lanes
    b = b_ref[...].astype(jnp.float32)
    o_ref[...] = (w * y + b).astype(o_ref.dtype)


def _round_up(v: int, m: int) -> int:
    return (v + m - 1) // m * m


def _vmem_capacity_bytes() -> int:
    try:
        return int(pltpu.get_tpu_info().vmem_capacity_bytes)
    except Exception:
        return 64 << 20  # conservative fallback (v7x physical VMEM)


def layernorm3d(x: jax.Array, weight: jax.Array, bias: jax.Array,
                eps: float = 1e-6) -> jax.Array:
    """x: (N, C, D, H, W); weight, bias: (C,). Returns same shape/dtype as x."""
    N, C, D, H, W = x.shape
    S = D * H * W
    itemsize = jnp.dtype(x.dtype).itemsize

    # Keep the output lane-dense: pad spatial extent to a multiple of 128.
    S_pad = _round_up(S, 128)

    # Size the spatial tile from a per-generation VMEM budget (mem-bound op:
    # big lane-dense tiles amortize the ~0.35us/step overhead and DMA setup).
    cap = _vmem_capacity_bytes()                       # 64 MiB v7x, 128 MiB v5e/v6e
    per_block_budget = min(max(cap // 16, 1 << 20), 8 << 20)
    ts_budget = max(128, (per_block_budget // (C * itemsize)) // 128 * 128)
    TS = min(ts_budget, S_pad)

    # Keep at least 2 grid steps so both v7x TensorCores get work.
    if N * pl.cdiv(S_pad, TS) < 2 and S_pad >= 256:
        TS = max(128, _round_up((S_pad + 1) // 2, 128))

    grid = (N, pl.cdiv(S_pad, TS))

    x2 = x.reshape(N, C, S)
    if S_pad != S:
        x2 = jnp.pad(x2, ((0, 0), (0, 0), (0, S_pad - S)))
    w2 = weight.reshape(C, 1)
    b2 = bias.reshape(C, 1)

    # Double-buffered input + output footprint; raise the scoped VMEM limit to
    # cover it (matters on v5e's 16 MiB default) while leaving headroom on v7x.
    block_bytes = C * TS * itemsize
    footprint = 2 * 2 * block_bytes
    vmem_limit = int(min(max(footprint + (8 << 20), 32 << 20), cap * 3 // 4))

    cost = pl.CostEstimate(
        flops=7 * N * C * S_pad,
        transcendentals=N * S_pad,
        bytes_accessed=2 * N * C * S_pad * itemsize + 2 * C * 4,
    )

    out2 = pl.pallas_call(
        functools.partial(_layernorm3d_kernel, eps=eps),
        out_shape=jax.ShapeDtypeStruct((N, C, S_pad), x.dtype),
        grid_spec=pltpu.PrefetchScalarGridSpec(
            num_scalar_prefetch=0,
            grid=grid,
            in_specs=[
                pl.BlockSpec((1, C, TS), lambda n, s: (n, 0, s)),
                pl.BlockSpec((C, 1), lambda n, s: (0, 0)),
                pl.BlockSpec((C, 1), lambda n, s: (0, 0)),
            ],
            out_specs=pl.BlockSpec((1, C, TS), lambda n, s: (n, 0, s)),
        ),
        compiler_params=pltpu.CompilerParams(
            dimension_semantics=("parallel", "parallel"),
            vmem_limit_bytes=vmem_limit,
        ),
        cost_estimate=cost,
    )(x2, w2, b2)

    if S_pad != S:
        out2 = out2[:, :, :S]
    return out2.reshape(N, C, D, H, W)


def layernorm3d_ref(x, weight, bias, eps=1e-6):
    xf = x.astype(jnp.float32)
    u = jnp.mean(xf, axis=1, keepdims=True)
    s = jnp.mean((xf - u) ** 2, axis=1, keepdims=True)
    y = (xf - u) / jnp.sqrt(s + eps)
    y = weight[None, :, None, None, None] * y + bias[None, :, None, None, None]
    return y.astype(x.dtype)


if __name__ == "__main__":
    # Case 1: lane-aligned spatial extent (S = 512), default torch init
    # (weight=ones, bias=zeros).
    key = jax.random.PRNGKey(0)
    N, C, D, H, W = 2, 4, 8, 8, 8
    x = jax.random.normal(key, (N, C, D, H, W), dtype=jnp.float32)
    weight = jnp.ones((C,), dtype=jnp.float32)
    bias = jnp.zeros((C,), dtype=jnp.float32)

    out = jax.block_until_ready(layernorm3d(x, weight, bias))
    ref = layernorm3d_ref(x, weight, bias)
    assert out.shape == x.shape and out.dtype == x.dtype
    assert jnp.allclose(out, ref, atol=1e-5, rtol=1e-5)

    # Case 2: non-multiple-of-128 spatial extent (S = 125 -> padded to 128)
    # with non-trivial affine params, exercising the padding path.
    k1, k2, k3 = jax.random.split(jax.random.PRNGKey(0), 3)
    N2, C2, D2, H2, W2 = 2, 8, 5, 5, 5
    x_b = jax.random.normal(k1, (N2, C2, D2, H2, W2), dtype=jnp.float32)
    w_b = jax.random.normal(k2, (C2,), dtype=jnp.float32)
    b_b = jax.random.normal(k3, (C2,), dtype=jnp.float32)

    out_b = jax.block_until_ready(layernorm3d(x_b, w_b, b_b))
    ref_b = layernorm3d_ref(x_b, w_b, b_b)
    assert out_b.shape == x_b.shape and out_b.dtype == x_b.dtype
    assert jnp.allclose(out_b, ref_b, atol=1e-5, rtol=1e-5)

    print("KERNEL_OK")
</pallas_src>

<mosaic_0001>
module attributes {stable_mosaic.version = 11 : i64} {
  func.func @_layernorm3d_kernel(%arg0: i32, %arg1: i32, %arg2: memref<1x4x512xf32, #tpu.memory_space<vmem>>, %arg3: memref<4x1xf32, #tpu.memory_space<vmem>>, %arg4: memref<4x1xf32, #tpu.memory_space<vmem>>, %arg5: memref<1x4x512xf32, #tpu.memory_space<vmem>>) attributes {dimension_semantics = [#tpu.dimension_semantics<parallel>, #tpu.dimension_semantics<parallel>], iteration_bounds = array<i64: 2, 1>, scalar_prefetch = 0 : i64, scratch_operands = 0 : i64, tpu.core_type = #tpu.core_type<tc>, window_params = [{transform_indices = @transform_0, window_bounds = array<i64: 1, 4, 512>}, {pipeline_mode = #tpu.pipeline_mode<synchronous>, transform_indices = @transform_1, window_bounds = array<i64: 4, 1>}, {pipeline_mode = #tpu.pipeline_mode<synchronous>, transform_indices = @transform_2, window_bounds = array<i64: 4, 1>}, {transform_indices = @transform_3, window_bounds = array<i64: 1, 4, 512>}]} {
    %c0 = arith.constant 0 : index
    %c0_0 = arith.constant 0 : index
    %c0_1 = arith.constant 0 : index
    %0 = vector.load %arg2[%c0, %c0_0, %c0_1] : memref<1x4x512xf32, #tpu.memory_space<vmem>>, vector<1x4x512xf32>
    %cst = arith.constant dense<0.000000e+00> : vector<1x512xf32>
    %1 = vector.multi_reduction <add>, %0, %cst [1] : vector<1x4x512xf32> to vector<1x512xf32>
    %2 = vector.shape_cast %1 : vector<1x512xf32> to vector<1x1x512xf32>
    %cst_2 = arith.constant 4.000000e+00 : f32
    %3 = vector.broadcast %cst_2 : f32 to vector<1x1x512xf32>
    %4 = arith.divf %2, %3 : vector<1x1x512xf32>
    %5 = vector.broadcast %4 : vector<1x1x512xf32> to vector<1x4x512xf32>
    %6 = arith.subf %0, %5 : vector<1x4x512xf32>
    %7 = arith.mulf %6, %6 : vector<1x4x512xf32>
    %cst_3 = arith.constant dense<0.000000e+00> : vector<1x512xf32>
    %8 = vector.multi_reduction <add>, %7, %cst_3 [1] : vector<1x4x512xf32> to vector<1x512xf32>
    %9 = vector.shape_cast %8 : vector<1x512xf32> to vector<1x1x512xf32>
    %cst_4 = arith.constant 4.000000e+00 : f32
    %10 = vector.broadcast %cst_4 : f32 to vector<1x1x512xf32>
    %11 = arith.divf %9, %10 : vector<1x1x512xf32>
    %cst_5 = arith.constant 9.99999997E-7 : f32
    %12 = vector.broadcast %cst_5 : f32 to vector<1x1x512xf32>
    %13 = arith.addf %11, %12 : vector<1x1x512xf32>
    %14 = math.rsqrt %13 : vector<1x1x512xf32>
    %15 = vector.broadcast %14 : vector<1x1x512xf32> to vector<1x4x512xf32>
    %16 = arith.mulf %6, %15 : vector<1x4x512xf32>
    %c0_6 = arith.constant 0 : index
    %c0_7 = arith.constant 0 : index
    %17 = vector.load %arg3[%c0_6, %c0_7] : memref<4x1xf32, #tpu.memory_space<vmem>>, vector<4x1xf32>
    %c0_8 = arith.constant 0 : index
    %c0_9 = arith.constant 0 : index
    %18 = vector.load %arg4[%c0_8, %c0_9] : memref<4x1xf32, #tpu.memory_space<vmem>>, vector<4x1xf32>
    %19 = vector.shape_cast %17 : vector<4x1xf32> to vector<1x4x1xf32>
    %20 = vector.broadcast %19 : vector<1x4x1xf32> to vector<1x4x512xf32>
    %21 = arith.mulf %20, %16 : vector<1x4x512xf32>
    %22 = vector.shape_cast %18 : vector<4x1xf32> to vector<1x4x1xf32>
    %23 = vector.broadcast %22 : vector<1x4x1xf32> to vector<1x4x512xf32>
    %24 = arith.addf %21, %23 : vector<1x4x512xf32>
    %c0_10 = arith.constant 0 : index
    %c0_11 = arith.constant 0 : index
    %c0_12 = arith.constant 0 : index
    %25 = vector.load %arg5[%c0_10, %c0_11, %c0_12] : memref<1x4x512xf32, #tpu.memory_space<vmem>>, vector<1x4x512xf32>
    tpu.vector_store %arg5[%c0_10, %c0_11, %c0_12], %24 {strides = array<i32>} : memref<1x4x512xf32, #tpu.memory_space<vmem>>, vector<1x4x512xf32>,
    return
  }
  func.func @transform_0(%arg0: i32, %arg1: i32) -> (i32, i32, i32) {
    %c0_i32 = arith.constant 0 : i32
    %c0_i32_0 = arith.constant 0 : i32
    return %arg0, %c0_i32, %arg1 : i32, i32, i32
  }
  func.func @transform_1(%arg0: i32, %arg1: i32) -> (i32, i32) {
    %c0_i32 = arith.constant 0 : i32
    %c0_i32_0 = arith.constant 0 : i32
    %c0_i32_1 = arith.constant 0 : i32
    return %c0_i32, %c0_i32_0 : i32, i32
  }
  func.func @transform_2(%arg0: i32, %arg1: i32) -> (i32, i32) {
    %c0_i32 = arith.constant 0 : i32
    %c0_i32_0 = arith.constant 0 : i32
    %c0_i32_1 = arith.constant 0 : i32
    return %c0_i32, %c0_i32_0 : i32, i32
  }
  func.func @transform_3(%arg0: i32, %arg1: i32) -> (i32, i32, i32) {
    %c0_i32 = arith.constant 0 : i32
    %c0_i32_0 = arith.constant 0 : i32
    return %arg0, %c0_i32, %arg1 : i32, i32, i32
  }
}

</mosaic_0001>

<bundles_post_ra>
// kernel: tpu_custom_call.1
= control target key start
LH: loop header
LB: loop body
LE: loop exit
PB: predicated region body
PF: predicated region fallthrough
CT: control target
= control target key end

     0   :  { %8 = vsyncpa [#allocation3], 0  ;;  %s836_s0 = inlined_call_operand.hbm [shape: f32[2,4,512], index: 0, kind: input, shape index: {}]   ;;  %s837_s1 = inlined_call_operand.vmem [shape: f32[4,1], index: 1, kind: input, shape index: {}]   ;;  %s838_s2 = inlined_call_operand.vmem [shape: f32[4,1], index: 2, kind: input, shape index: {}]   ;;  %s839_s3 = inlined_call_operand.hbm [shape: f32[2,4,512], index: 3, kind: output, shape index: {}]  }
   0x1   :  { %10 = vsyncpa [#allocation3 + $0x1], 0 }
   0x2   :  { %11 = vsyncpa [#allocation4], 0 }
   0x3   :  { %13 = vsyncpa [#allocation4 + $0x1], 0  ;;  %s678_s12 = smov 0   ;;  %s680_s13 = smov 0  }
   0x4   :  { %s682_s14 = smov 0   ;;  %s684_s15 = smov 0  }
   0x5   :  { %s686_s16 = smov 0   ;;  %s688_s17 = smov 0  }
   0x6 LB: > { %s454_s18 = sadd.s32 4294967295, %s653_s17   ;;  %s455_s19 = sadd.s32 4294967294, %s653_s17   ;;  %s653_s17 = sphi %s688_s17, %s19_s17   ;;  %s649_s16 = sphi %s686_s16, %s851_s16   ;;  %s645_s15 = sphi %s684_s15, %s850_s15   ;;  %s641_s14 = sphi %s682_s14, %s849_s14   ;;  %s637_s13 = sphi %s680_s13, %s848_s13   ;;  %s633_s12 = sphi %s678_s12, %s847_s12  }
   0x7   : > { %s31_s20 = sadd.s32 1, %s649_s16  ;;  %s40_s21 = sadd.s32 1, %s641_s14 }
   0x8   : > { %p33_p0 = scmp.ge.s32.totalorder %s31_s20, 2  ;;  %p47_p1 = scmp.ne.s32.totalorder %s641_s14, %s637_s13 }
   0x9   : > { %p48_p2 = scmp.eq.s32.totalorder %s653_s17, 0  ;;  %p53_p3 = scmp.ne.s32.totalorder %s637_s13, %s633_s12 }
   0xa   : > { %s853_s20 = smov (%p33_p0, %s31_s20), 0  ;;  %p54_p5 = scmp.eq.s32.totalorder %s454_s18, 0 }
   0xb   : > { %p719_p4 = por %p48_p2, %p47_p1  ;;  %s35_s23 = ssub.s32 %s649_s16, %s853_s20 }
   0xc   : > { %p121_p6 = scmp.eq.s32.totalorder %s454_s18, 1  ;;  %p38_p7 = scmp.eq.s32.totalorder %s35_s23, 0 }
   0xd   : > { %p725_p8 = por %p54_p5, %p53_p3  ;;  %p127_p10 = scmp.eq.s32.totalorder %s455_s19, 1 }
   0xe   : > { %p729_p9 = por %p121_p6, %p47_p1  ;;  %p483_p13 = scmp.lt.s32.totalorder %s653_s17, 2 }
   0xf   : > { %s734_s26 = scalar_select %p38_p7, %s641_s14, %s40_s21  }
  0x10   : > { %p736_p11 = por %p127_p10, %p53_p3  ;;  %s153_s28 = sand.u32 1, %s641_s14  }
  0x11   : > { %s458_s29 = sshll.u32 %s153_s28, 4  ;;  %s469_s30 = sshll.u32 %s649_s16, 8 }
  0x12   : > { %s843_s27 = scalar_select %p736_p11, 1, 0 }
  0x13   : > { %s165_s6 = scalar_lea.hbm %s836_s0, %s469_s30  ;;  %s157_s7 = scalar_lea.vmem [#allocation2], %s458_s29 }
  0x14   : > { %s167_s8 = sshll.u32 %s157_s7, 4  ;;  %p749_p0 = pnand %p483_p13, %p719_p4  ;;  %s168_s8 = int_to_ptr.vmem [resolvable:$true] %s167_s8 }
  0x15   : > { %p461_p1 = scmp.ge.s32.totalorder %s653_s17, 1  ;;  %p172_p2 = scmp.lt.s32.totalorder %s653_s17, 3 }
  0x16   : > { %s154_s10 = scalar_lea.sflag [#allocation3], %s153_s28  ;;  %p547_p3 = pneg %p749_p0 }
  0x17   : > { %s558_s11 = scalar_lea.vmem %s168_s8, 256  ;;  %s655_s18 = smov [#allocation2]  }
  0x18   : > { %p559_p5 = scmp.ne.s32.totalorder %s168_s8, %s558_s11  ;;  %s563_s19 = sshll.u32 %s655_s18, 4  ;;  %s564_s19 = int_to_ptr.vmem [resolvable:$false] %s563_s19 }
  0x19   : > { %s565_s21 = scalar_lea.vmem %s564_s19, 512  ;;  %p566_p10 = scmp.lt.s32.totalorder %s168_s8, %s564_s19 }
  0x1a   : > { %p561_p6 = pnand %p559_p5, %p547_p3  ;;  %p567_p12 = scmp.lt.s32.totalorder %s565_s21, %s558_s11 }
  0x1c   : > { %p562_p7 = pneg %p561_p6  ;;  %p568_p4 = por %p567_p12, %p566_p10 }
  0x1e   : > { %p569_p13 = pnand %p568_p4, %p562_p7 }
  0x20   : > { %572 = shalt.err (!%p569_p13)
}
  0x21   : > { %478 = dma.hbm_to_vmem [thread:$0]  (!%p749_p0), %s165_s6, 256, %s168_s8, %s154_s10  }
  0x22   : > { %p173_p11 = pnand %p461_p1, %p172_p2 }
  0x23   : > { %s764_s22 = sand.u32 (!%p173_p11), 1, %s637_s13  }
  0x24   : > { %176 = sbr.rel (%p173_p11) target bundleno = 189 (0xbd), region = 32  ;;  %s462_s23 = sshll.u32 (!%p173_p11), %s764_s22, 4 }
  0x25   : > { %s179_s28 = scalar_lea.sflag (!%p173_p11), [#allocation3], %s764_s22  ;;  %s182_s29 = scalar_lea.vmem (!%p173_p11), [#allocation2], %s462_s23 }
  0x29   : > { %624 = dma.done.wait (%p725_p8), %s179_s28, 256  }
  0x2a   : > { %626 = vsyncadd (%p725_p8), %s179_s28, 4294967040  ;;  %v656_v0 = vmov 0   ;;  %v317_v1 = vld [vmem:[%s837_s1] sm:$0xf]  ;;  %v208_v4 = vld [vmem:[%s182_s29 + $0x8] sm:$0xff]  ;;  %vm215_vm0 = vcmask 1043456  }
  0x2b   : > { %534 = vset.pattern.permute.xlu0 %v656_v0  ;;  %v318_v2 = vld [vmem:[%s838_s2] sm:$0xf]  ;;  %v212_v6 = vcombine.high %v208_v4, %v208_v4  ;;  %v230_v9 = vsel %vm215_vm0, %v208_v4, 0.0  ;;  %s470_s24 = sshll.u32 %s645_s15, 8  ;;  %s204_s7 = scalar_lea.vmem [#allocation5], %s462_s23 }
  0x2c   : > { %321 = vperm.xlu0 %534, %v317_v1   ;;  %v207_v3 = vld [vmem:[%s182_s29] sm:$0xff]  ;;  %v231_v13 = vrot.slane %v230_v9, 4  ;;  %s370_s8 = sshll.u32 %s204_s7, 4  ;;  %s794_s11 = scalar_lea.hbm %s839_s3, %s470_s24  ;;  %s371_s8 = int_to_ptr.vmem [resolvable:$true] %s370_s8 }
  0x2d   : > { %v211_v5 = vcombine.high %v207_v3, %v207_v3  ;;  %v216_v7 = vsel %vm215_vm0, %v207_v3, 0.0  ;;  %v237_v10 = vsel %vm215_vm0, %v212_v6, 0.0  ;;  %s354_s18 = scalar_lea.sflag [#allocation4], %s764_s22  ;;  %s573_s15 = scalar_lea.vmem %s371_s8, 256 }
  0x2e   : > { %v217_v11 = vrot.slane %v216_v7, 4  ;;  %v238_v14 = vrot.slane %v237_v10, 4  ;;  %v232_v17 = vadd.f32 %v231_v13, %v230_v9  ;;  %p574_p8 = scmp.ne.s32.totalorder %s371_s8, %s573_s15  ;;  %s657_s19 = smov [#allocation5]  }
  0x2f   : > { %v223_v8 = vsel %vm215_vm0, %v211_v5, 0.0  ;;  %s577_s21 = sshll.u32 %s657_s19, 4  ;;  %s578_s21 = int_to_ptr.vmem [resolvable:$false] %s577_s21 }
  0x30   : > { %336 = vperm.xlu0 %534, %v318_v2   ;;  %v224_v12 = vrot.slane %v223_v8, 4  ;;  %v218_v15 = vadd.f32 %v217_v11, %v216_v7  ;;  %v239_v18 = vadd.f32 %v238_v14, %v237_v10  ;;  %v233_v21 = vrot.slane %v232_v17, 2  ;;  %p575_p11 = pnand %p574_p8, %p729_p9  ;;  %s579_s23 = scalar_lea.vmem %s578_s21, 512 }
  0x31   : > { %p580_p0 = scmp.lt.s32.totalorder %s371_s8, %s578_s21  ;;  %p581_p1 = scmp.lt.s32.totalorder %s579_s23, %s573_s15 }
  0x32   : > { %v225_v16 = vadd.f32 %v224_v12, %v223_v8  ;;  %v219_v19 = vrot.slane %v218_v15, 2  ;;  %v240_v22 = vrot.slane %v239_v18, 2  ;;  %v234_v25 = vadd.f32 %v233_v21, %v232_v17  ;;  %p576_p12 = pneg %p575_p11 }
  0x33   : > { %p582_p2 = por %p581_p1, %p580_p0 }
  0x34   : > { %v226_v20 = vrot.slane %v225_v16, 2  ;;  %v220_v23 = vadd.f32 %v219_v19, %v218_v15  ;;  %v241_v26 = vadd.f32 %v240_v22, %v239_v18  ;;  %v235_v29 = vrot.slane %v234_v25, 1 }
  0x35   : > { %p583_p3 = pnand %p582_p2, %p576_p12 }
  0x36   : > { %v227_v24 = vadd.f32 %v226_v20, %v225_v16  ;;  %v221_v27 = vrot.slane %v220_v23, 1  ;;  %v242_v30 = vrot.slane %v241_v26, 1  ;;  %v236_v33 = vadd.f32 %v235_v29, %v234_v25 }
  0x38   : > { %v228_v28 = vrot.slane %v227_v24, 1  ;;  %v222_v31 = vadd.f32 %v221_v27, %v220_v23  ;;  %v243_v34 = vadd.f32 %v242_v30, %v241_v26  ;;  %v247_v37 = vmul.f32 0.25, %v236_v33 }
  0x3a   : > { %v229_v32 = vadd.f32 %v228_v28, %v227_v24  ;;  %v245_v35 = vmul.f32 0.25, %v222_v31  ;;  %v248_v38 = vmul.f32 0.25, %v243_v34 }
  0x3c   : > { %v246_v36 = vmul.f32 0.25, %v229_v32  ;;  %v254_v40 = vcombine.low %v247_v37, %v248_v38 }
  0x3e   : > { %v253_v39 = vcombine.low %v245_v35, %v246_v36  ;;  %v258_v42 = vsub.f32 %v208_v4, %v254_v40 }
  0x40   : > { %v257_v41 = vsub.f32 %v207_v3, %v253_v39  ;;  %v260_v44 = vmul.f32 %v258_v42, %v258_v42 }
  0x42   : > { %v259_v43 = vmul.f32 %v257_v41, %v257_v41  ;;  %v264_v46 = vcombine.high %v260_v44, %v260_v44  ;;  %v281_v48 = vsel %vm215_vm0, %v260_v44, 0.0 }
  0x43   : > { %v282_v52 = vrot.slane %v281_v48, 4 }
  0x44   : > { %v263_v45 = vcombine.high %v259_v43, %v259_v43  ;;  %v267_v47 = vsel %vm215_vm0, %v259_v43, 0.0  ;;  %v288_v51 = vsel %vm215_vm0, %v264_v46, 0.0 }
  0x45   : > { %v268_v50 = vrot.slane %v267_v47, 4  ;;  %v289_v54 = vrot.slane %v288_v51, 4  ;;  %v283_v56 = vadd.f32 %v282_v52, %v281_v48 }
  0x46   : > { %v274_v49 = vsel %vm215_vm0, %v263_v45, 0.0 }
  0x47   : > { %v275_v53 = vrot.slane %v274_v49, 4  ;;  %v269_v55 = vadd.f32 %v268_v50, %v267_v47  ;;  %v290_v58 = vadd.f32 %v289_v54, %v288_v51  ;;  %v284_v60 = vrot.slane %v283_v56, 2 }
  0x49   : > { %v276_v57 = vadd.f32 %v275_v53, %v274_v49  ;;  %v270_v59 = vrot.slane %v269_v55, 2  ;;  %v291_v62 = vrot.slane %v290_v58, 2  ;;  %v285_v0 = vadd.f32 %v284_v60, %v283_v56 }
  0x4b   : > { %v277_v61 = vrot.slane %v276_v57, 2  ;;  %v271_v63 = vadd.f32 %v270_v59, %v269_v55  ;;  %v292_v2 = vadd.f32 %v291_v62, %v290_v58  ;;  %v286_v4 = vrot.slane %v285_v0, 1 }
  0x4d   : > { %v278_v1 = vadd.f32 %v277_v61, %v276_v57  ;;  %v272_v3 = vrot.slane %v271_v63, 1  ;;  %v293_v6 = vrot.slane %v292_v2, 1  ;;  %v287_v8 = vadd.f32 %v286_v4, %v285_v0 }
  0x4f   : > { %v279_v5 = vrot.slane %v278_v1, 1  ;;  %v273_v7 = vadd.f32 %v272_v3, %v271_v63  ;;  %v294_v10 = vadd.f32 %v293_v6, %v292_v2  ;;  %v297_v12 = vmul.f32 0.25, %v287_v8 }
  0x51   : > { %v280_v9 = vadd.f32 %v279_v5, %v278_v1  ;;  %v295_v11 = vmul.f32 0.25, %v273_v7  ;;  %v298_v14 = vmul.f32 0.25, %v294_v10  ;;  %v301_v16 = vadd.f32 1e-06, %v297_v12 }
  0x53   : > { %v296_v13 = vmul.f32 0.25, %v280_v9  ;;  %v299_v15 = vadd.f32 1e-06, %v295_v11  ;;  %v302_v18 = vadd.f32 1e-06, %v298_v14 }
  0x55   : > { %v300_v17 = vadd.f32 1e-06, %v296_v13  ;;  %537 = vrsqrt.f32 %v299_v15 }
  0x56   : > { %539 = vrsqrt.f32 %v301_v16 }
  0x57   : > { %541 = vrsqrt.f32 %v300_v17 }
  0x58   : > { %543 = vrsqrt.f32 %v302_v18 }
  0x62   : > { %v538_v19 = vpop.eup %537 }
  0x63   : > { %v540_v20 = vpop.eup %539 }
  0x64   : > { %v542_v21 = vpop.eup %541 }
  0x65   : > { %v544_v22 = vpop.eup %543  ;;  %v311_v23 = vcombine.low %v538_v19, %v542_v21 }
  0x66   : > { %v312_v24 = vcombine.low %v540_v20, %v544_v22 }
  0x67   : > { %v315_v25 = vmul.f32 %v311_v23, %v257_v41 }
  0x68   : > { %v316_v26 = vmul.f32 %v312_v24, %v258_v42 }
  0x69   : > { %v326_v27 = vcombine.high %v315_v25, %v315_v25 }
  0x6a   : > { %v327_v28 = vcombine.high %v316_v26, %v316_v26 }
  0xa7   : > { %v322_v29 = vpop.permute.xlu0 %321 }
  0xa8   : > { %v330_v30 = vmul.f32 %v322_v29, %v315_v25  ;;  %v331_v31 = vmul.f32 %v326_v27, %v322_v29  ;;  %v332_v32 = vmul.f32 %v322_v29, %v316_v26  ;;  %v333_v33 = vmul.f32 %v327_v28, %v322_v29 }
  0xab   : > { %v337_v34 = vpop.permute.xlu0 %336 }
  0xac   : > { %v339_v35 = vadd.f32 %v337_v34, %v330_v30  ;;  %v340_v36 = vadd.f32 %v337_v34, %v331_v31  ;;  %v341_v37 = vadd.f32 %v337_v34, %v332_v32  ;;  %v342_v38 = vadd.f32 %v337_v34, %v333_v33 }
  0xae   : > { %v347_v39 = vcombine.low %v339_v35, %v340_v36  ;;  %v348_v40 = vcombine.low %v341_v37, %v342_v38 }
  0xb0   : > { %351 = vst [vmem:[%s204_s7] sm:$0xff] %v347_v39  ;;  %352 = vst [vmem:[%s204_s7 + $0x8] sm:$0xff] %v348_v40 }
  0xb1   : > { %586 = shalt.err (!%p583_p3)
}
  0xb2   : > { %s587_s28 = scalar_lea.hbm %s794_s11, 256  ;;  %s591_s30 = scalar_lea.hbm %s839_s3, 512 }
  0xb3   : > { %p588_p5 = scmp.ne.s32.totalorder %s794_s11, %s587_s28  ;;  %p592_p10 = scmp.lt.s32.totalorder %s794_s11, %s839_s3 }
  0xb4   : > { %p593_p4 = scmp.lt.s32.totalorder %s591_s30, %s587_s28 }
  0xb5   : > { %p589_p6 = pnand %p588_p5, %p729_p9 }
  0xb6   : > { %p594_p13 = por %p593_p4, %p592_p10 }
  0xb7   : > { %p590_p7 = pneg %p589_p6 }
  0xb9   : > { %p595_p8 = pnand %p594_p13, %p590_p7 }
  0xbb   : > { %598 = shalt.err (!%p595_p8)
}
  0xbc   : > { %473 = dma.vmem_to_hbm [thread:$0]  (%p729_p9), %s371_s8, 256, %s794_s11, %s354_s18  }
  0xbd PF: > { %s382_s6 = sand.u32 1, %s633_s12   ;;  %p845_p11 = scmp.ne.s32.totalorder %s843_s27, 0 }
  0xbe   : > { %p846_p12 = scmp.ge.s32.totalorder %s653_s17, 2  ;;  %s383_s24 = scalar_lea.sflag [#allocation4], %s382_s6 }
  0xc0   : > { %p480_p0 = pnand %p846_p12, %p845_p11 }
  0xc2   : > { %p481_p1 = pneg %p480_p0 }
  0xc4   : > { %628 = dma.done.wait (%p481_p1), %s383_s24, 256  }
  0xc5   : > { %630 = vsyncadd (%p481_p1), %s383_s24, 4294967040  ;;  %s19_s17 = sadd.s32 1, %s653_s17   ;;  %s847_s12 = smov %s637_s13 }
  0xc6   : > { %p16_p2 = scmp.ge.s32.totalorder %s19_s17, 4   ;;  %s848_s13 = smov %s641_s14 }
  0xc7   : > { %s849_s14 = smov %s734_s26  ;;  %s850_s15 = smov %s649_s16 }
  0xc8   : > { %s851_s16 = smov %s853_s20  ;;  %18 = sbr.rel (!%p16_p2) target bundleno = 6 (0x6), region = 77 }
  0xcd   :  { %388 = vsyncpa [#allocation3], 1 }
  0xce   :  { %390 = vsyncpa [#allocation3 + $0x1], 1 }
  0xcf   :  { %391 = vsyncpa [#allocation4], 1 }
  0xd0   :  { %393 = vsyncpa [#allocation4 + $0x1], 1 }

</bundles_post_ra>
